<compile_context>
chip_gen: v7x
topology: tpu7x:2x2x1
jax: 0.10.0
libtpu: 0.0.40
codegen_flags: <defaults>
</compile_context>

<pallas_src>
import jax
import jax.numpy as jnp
from jax.experimental import pallas as pl
from jax.experimental.pallas import tpu as pltpu

_LANE = 128


def _round_up(x, m):
    return (x + m - 1) // m * m


def _itemsize(dt):
    return jnp.dtype(dt).itemsize


def _fb_stream2pb_kernel(x_ref, w_ref, b_ref, o_ref):
    # x_ref: (tm, F), w_ref: (S_pad, F), b_ref: (1, S_pad), o_ref: (tm, S)
    x = x_ref[...]
    w = w_ref[...]
    if x.dtype != w.dtype:
        # One VPU cast per streamed x tile; pass bf16 x end-to-end to skip it
        # and halve the dominant HBM read.
        x = x.astype(w.dtype)
    # (tm, F) . (S_pad, F)^T -> (tm, S_pad): contract last dims of both
    # operands, no transpose materialized, f32 accumulation on the MXU.
    y = jax.lax.dot_general(
        x, w,
        dimension_numbers=(((1,), (1,)), ((), ())),
        preferred_element_type=jnp.float32,
    )
    y = jnp.maximum(y + b_ref[...], 0.0)        # f32 epilogue (v5e-safe)
    s = o_ref.shape[-1]
    o_ref[...] = y[:, :s].astype(o_ref.dtype)   # un-padded [tm, S] store


def prepare_params(weight, bias, compute_dtype=jnp.bfloat16):
    """One-time parameter prep (do at init, not per forward).

    weight: [stage_num, fc_size], bias: [stage_num] ->
      weight_padded: [S_pad, fc_size] in compute_dtype (S_pad = ceil(S/128)*128)
      bias_padded:   [1, S_pad] float32
    Zero-padding the stage dim keeps the MXU operand / accumulator lane-dense;
    casting W here (not in-kernel) avoids a per-grid-step VPU cast of a block
    that never changes.
    """
    S, F = weight.shape
    S_pad = _round_up(S, _LANE)
    w_p = jnp.zeros((S_pad, F), compute_dtype).at[:S, :].set(
        weight.astype(compute_dtype))
    b_p = jnp.zeros((1, S_pad), jnp.float32).at[0, :S].set(
        bias.astype(jnp.float32))
    return w_p, b_p


def fb_stream2pb_apply(x, weight_padded, bias_padded, stage_num, *,
                       block_m=1024, out_dtype=None,
                       single_buffer_params=False, interpret=False):
    """Pallas forward. x: [B, F]; padded params from prepare_params."""
    B, F = x.shape
    S_pad, Fw = weight_padded.shape
    assert Fw == F, (Fw, F)
    S = int(stage_num)
    out_dtype = x.dtype if out_dtype is None else out_dtype

    # --- batch tile --------------------------------------------------------
    # block_m should be a multiple of 8; if B < block_m the tile equals the
    # full batch dim (always legal). Bigger tiles amortize the ~0.35us per
    # grid-step overhead on v5e/v6e.
    tm = min(block_m, B)
    grid_m = pl.cdiv(B, tm)
    # v7x megacore: when the batch is big enough, keep >= 2 batch tiles so
    # dimension_semantics=("parallel",) actually feeds both TensorCores.
    if grid_m < 2 and B >= 512:
        tm = _round_up(pl.cdiv(B, 2), 8)
        grid_m = pl.cdiv(B, tm)

    # --- VMEM budget (explicit, with headroom; <= 56 MiB fits v7x's 64 MiB) -
    est = (2 * tm * F * _itemsize(x.dtype)                  # double-buffered x
           + 2 * tm * S * _itemsize(out_dtype)              # double-buffered out
           + 2 * S_pad * F * _itemsize(weight_padded.dtype)  # resident W (conservative x2)
           + 2 * S_pad * _itemsize(bias_padded.dtype))
    vmem_limit = int(min(max(2 * est, 16 << 20), 56 << 20))

    # --- cost estimate for XLA's scheduler ----------------------------------
    flops = 2 * B * F * S_pad
    bytes_accessed = (B * F * _itemsize(x.dtype)
                      + S_pad * F * _itemsize(weight_padded.dtype)
                      + S_pad * _itemsize(bias_padded.dtype)
                      + B * S * _itemsize(out_dtype))

    # Resident (constant index_map) params can be single-buffered to reclaim
    # one (S_pad, F) weight copy of VMEM at large F.  Opt-in.
    param_spec_kw = dict(pipeline_mode=pl.Buffered(1)) if single_buffer_params else {}

    return pl.pallas_call(
        _fb_stream2pb_kernel,
        out_shape=jax.ShapeDtypeStruct((B, S), out_dtype),
        grid=(grid_m,),
        in_specs=[
            pl.BlockSpec((tm, F), lambda i: (i, 0)),                    # x streamed over batch
            pl.BlockSpec((S_pad, F), lambda i: (0, 0), **param_spec_kw),  # W resident
            pl.BlockSpec((1, S_pad), lambda i: (0, 0), **param_spec_kw),  # bias resident
        ],
        out_specs=pl.BlockSpec((tm, S), lambda i: (i, 0)),              # true [B, S] output
        compiler_params=pltpu.CompilerParams(
            dimension_semantics=("parallel",),   # batch tiles independent -> megacore
            vmem_limit_bytes=vmem_limit,
        ),
        cost_estimate=pl.CostEstimate(
            flops=flops, transcendentals=0, bytes_accessed=bytes_accessed),
        interpret=interpret,
    )(x, weight_padded, bias_padded)


class FBStream2PBPallas:
    """Eval-mode FBStream2PB with init-time param prep (pad + cast once)."""

    def __init__(self, weight, bias, *, compute_dtype=jnp.bfloat16,
                 block_m=1024):
        self.stage_num = int(weight.shape[0])
        self.block_m = block_m
        self.w_p, self.b_p = prepare_params(weight, bias, compute_dtype)

    def __call__(self, x, **kwargs):
        return fb_stream2pb_apply(x, self.w_p, self.b_p, self.stage_num,
                                  block_m=self.block_m, **kwargs)


def fb_stream2pb_forward(x, weight, bias, *, force_pallas=False,
                         compute_dtype=jnp.float32, **kwargs):
    """Module-equivalent forward from raw [S, F] weight / [S] bias.

    Tiny problems route to a fused XLA expression (pallas_call launch overhead
    dominates there).  Note: this re-pads the weight per call; in real usage
    build an FBStream2PBPallas once at init instead.
    """
    B, F = x.shape
    if not force_pallas and B * F < (1 << 16):
        return jnp.maximum(x @ weight.T + bias, 0.0)
    w_p, b_p = prepare_params(weight, bias, compute_dtype)
    return fb_stream2pb_apply(x, w_p, b_p, weight.shape[0], **kwargs)


def reference_forward(x, weight, bias):
    # Pure-JAX reference of eval-mode FBStream2PB.
    return jnp.maximum(x @ weight.T + bias, 0.0)


if __name__ == "__main__":
    # Small shapes consistent with the module: fc_size=32, stage_num=4, batch=8.
    B, FC_SIZE, STAGE_NUM = 8, 32, 4

    key = jax.random.PRNGKey(0)
    k_x, k_w, k_b = jax.random.split(key, 3)

    x = jax.random.normal(k_x, (B, FC_SIZE), dtype=jnp.float32)

    # Deterministic parameter init (mirrors nn.Linear's uniform fan-in bound).
    bound = 1.0 / (FC_SIZE ** 0.5)
    weight = jax.random.uniform(
        k_w, (STAGE_NUM, FC_SIZE), minval=-bound, maxval=bound,
        dtype=jnp.float32)
    bias = jax.random.uniform(
        k_b, (STAGE_NUM,), minval=-bound, maxval=bound, dtype=jnp.float32)

    ref = reference_forward(x, weight, bias)

    # f32 compute path (tight tolerance).
    mod_f32 = FBStream2PBPallas(weight, bias, compute_dtype=jnp.float32)
    out = jax.block_until_ready(mod_f32(x))
    assert out.shape == (B, STAGE_NUM)
    assert jnp.allclose(out, ref, atol=1e-5, rtol=1e-5)

    # bf16 MXU path (production default) -- looser tolerance (inputs/weights
    # are bf16, accumulation stays f32).
    mod_bf16 = FBStream2PBPallas(weight, bias, compute_dtype=jnp.bfloat16)
    out_bf = jax.block_until_ready(mod_bf16(x))
    assert out_bf.shape == (B, STAGE_NUM)
    assert jnp.allclose(out_bf, ref, atol=5e-2, rtol=5e-2)

    # Dispatching forward (routes this toy shape to fused XLA).
    out2 = jax.block_until_ready(fb_stream2pb_forward(x, weight, bias))
    assert jnp.allclose(out2, ref, atol=1e-5, rtol=1e-5)

    print("KERNEL_OK")
</pallas_src>

<mosaic_0001>
module attributes {stable_mosaic.version = 11 : i64} {
  func.func @_fb_stream2pb_kernel(%arg0: i32, %arg1: memref<8x32xf32, #tpu.memory_space<vmem>>, %arg2: memref<128x32xf32, #tpu.memory_space<vmem>>, %arg3: memref<1x128xf32, #tpu.memory_space<vmem>>, %arg4: memref<8x4xf32, #tpu.memory_space<vmem>>) attributes {dimension_semantics = [#tpu.dimension_semantics<parallel>], iteration_bounds = array<i64: 1>, scalar_prefetch = 0 : i64, scratch_operands = 0 : i64, tpu.core_type = #tpu.core_type<tc>, window_params = [{transform_indices = @transform_0, window_bounds = array<i64: 8, 32>}, {pipeline_mode = #tpu.pipeline_mode<synchronous>, transform_indices = @transform_1, window_bounds = array<i64: 128, 32>}, {pipeline_mode = #tpu.pipeline_mode<synchronous>, transform_indices = @transform_2, window_bounds = array<i64: 1, 128>}, {transform_indices = @transform_3, window_bounds = array<i64: 8, 4>}]} {
    %c0 = arith.constant 0 : index
    %c0_0 = arith.constant 0 : index
    %0 = vector.load %arg1[%c0, %c0_0] : memref<8x32xf32, #tpu.memory_space<vmem>>, vector<8x32xf32>
    %c0_1 = arith.constant 0 : index
    %c0_2 = arith.constant 0 : index
    %1 = vector.load %arg2[%c0_1, %c0_2] : memref<128x32xf32, #tpu.memory_space<vmem>>, vector<128x32xf32>
    %cst = arith.constant dense<0.000000e+00> : vector<8x128xf32>
    %2 = tpu.matmul %0, %1, %cst {dimension_numbers = #tpu.dot_dimension_numbers<[1], [1], [0], [0], [0, 0, 1, 0], [], []>} : vector<8x32xf32>, vector<128x32xf32>, vector<8x128xf32> -> vector<8x128xf32>
    %c0_3 = arith.constant 0 : index
    %c0_4 = arith.constant 0 : index
    %3 = vector.load %arg3[%c0_3, %c0_4] : memref<1x128xf32, #tpu.memory_space<vmem>>, vector<1x128xf32>
    %4 = vector.broadcast %3 : vector<1x128xf32> to vector<8x128xf32>
    %5 = arith.addf %2, %4 : vector<8x128xf32>
    %cst_5 = arith.constant 0.000000e+00 : f32
    %6 = vector.broadcast %cst_5 : f32 to vector<8x128xf32>
    %7 = arith.maximumf %5, %6 : vector<8x128xf32>
    %8 = vector.extract_strided_slice %7 {offsets = [0, 0], sizes = [8, 4], strides = [1, 1]} : vector<8x128xf32> to vector<8x4xf32>
    %c0_6 = arith.constant 0 : index
    %c0_7 = arith.constant 0 : index
    %9 = vector.load %arg4[%c0_6, %c0_7] : memref<8x4xf32, #tpu.memory_space<vmem>>, vector<8x4xf32>
    tpu.vector_store %arg4[%c0_6, %c0_7], %8 {strides = array<i32>} : memref<8x4xf32, #tpu.memory_space<vmem>>, vector<8x4xf32>,
    return
  }
  func.func @transform_0(%arg0: i32) -> (i32, i32) {
    %c0_i32 = arith.constant 0 : i32
    %c0_i32_0 = arith.constant 0 : i32
    return %arg0, %c0_i32 : i32, i32
  }
  func.func @transform_1(%arg0: i32) -> (i32, i32) {
    %c0_i32 = arith.constant 0 : i32
    %c0_i32_0 = arith.constant 0 : i32
    %c0_i32_1 = arith.constant 0 : i32
    return %c0_i32, %c0_i32_0 : i32, i32
  }
  func.func @transform_2(%arg0: i32) -> (i32, i32) {
    %c0_i32 = arith.constant 0 : i32
    %c0_i32_0 = arith.constant 0 : i32
    %c0_i32_1 = arith.constant 0 : i32
    return %c0_i32, %c0_i32_0 : i32, i32
  }
  func.func @transform_3(%arg0: i32) -> (i32, i32) {
    %c0_i32 = arith.constant 0 : i32
    %c0_i32_0 = arith.constant 0 : i32
    return %arg0, %c0_i32 : i32, i32
  }
}

</mosaic_0001>

<bundles_post_ra>
// kernel: tpu_custom_call.1
= control target key start
LH: loop header
LB: loop body
LE: loop exit
PB: predicated region body
PF: predicated region fallthrough
CT: control target
= control target key end

     0   :  { %vm38_vm0 = vcmask 261120   ;;  %v272_v0 = vmov 0.0|0.0   ;;  %vm273_vm2 = vmmov 0   ;;  %v274_v4 = vmov 0.0   ;;  %s375_s1 = inlined_call_operand.vmem [shape: f32[128,32], index: 1, kind: input, shape index: {}]   ;;  %s376_s0 = inlined_call_operand.vmem [shape: f32[8,32], index: 0, kind: input, shape index: {}]   ;;  %s377_s2 = inlined_call_operand.vmem [shape: f32[1,128], index: 2, kind: input, shape index: {}]   ;;  %s378_s3 = inlined_call_operand.vmem [shape: f32[8,4], index: 3, kind: output, shape index: {}]  }
   0x1   :  { %237 = vmatprep.subr.bf16.mxu0 %v272_v0  ;;  %v15_v1 = vld [vmem:[%s375_s1] sm:$0xff]  ;;  %v16_v2 = vld [vmem:[%s375_s1 + $0x8] sm:$0xff]  ;;  %vm303_vm1 = vmpackc.low %vm38_vm0, %vm38_vm0  ;;  %234 = vmatprep.mubr.msk.f32.mxu0 %vm273_vm2, %v274_v4  ;;  %vm161_vm3 = vcmask 31744  }
   0x2   :  { %v238_v5 = vpack.c.bf16 %v16_v2, %v15_v1  ;;  %v17_v6 = vld [vmem:[%s375_s1 + $0x10] sm:$0xff]  ;;  %v18_v7 = vld [vmem:[%s375_s1 + $0x18] sm:$0xff]  ;;  %v19_v9 = vld [vmem:[%s375_s1 + $0x20] sm:$0xff] }
   0x3   :  { %v242_v8 = vpack.c.bf16 %v18_v7, %v17_v6  ;;  %v20_v10 = vld [vmem:[%s375_s1 + $0x28] sm:$0xff]  ;;  %v21_v12 = vld [vmem:[%s375_s1 + $0x30] sm:$0xff]  ;;  %v22_v13 = vld [vmem:[%s375_s1 + $0x38] sm:$0xff] }
   0x4   :  { %240 = vmatpush3.bf16.xpose.msk.msra.mxu0 %vm303_vm1, %v238_v5  ;;  %v246_v11 = vpack.c.bf16 %v20_v10, %v19_v9  ;;  %v250_v14 = vpack.c.bf16 %v22_v13, %v21_v12  ;;  %v23_v15 = vld [vmem:[%s375_s1 + $0x40] sm:$0xff]  ;;  %v24_v16 = vld [vmem:[%s375_s1 + $0x48] sm:$0xff]  ;;  %v25_v18 = vld [vmem:[%s375_s1 + $0x50] sm:$0xff] }
   0x5   :  { %241 = vmatprep.subr.bf16.mxu0 %v272_v0  ;;  %v254_v17 = vpack.c.bf16 %v24_v16, %v23_v15  ;;  %v26_v19 = vld [vmem:[%s375_s1 + $0x58] sm:$0xff]  ;;  %v27_v21 = vld [vmem:[%s375_s1 + $0x60] sm:$0xff]  ;;  %v28_v22 = vld [vmem:[%s375_s1 + $0x68] sm:$0xff] }
   0x6   :  { %v258_v20 = vpack.c.bf16 %v26_v19, %v25_v18  ;;  %v262_v23 = vpack.c.bf16 %v28_v22, %v27_v21  ;;  %v29_v24 = vld [vmem:[%s375_s1 + $0x70] sm:$0xff]  ;;  %v30_v25 = vld [vmem:[%s375_s1 + $0x78] sm:$0xff]  ;;  %v14_v27 = vld [vmem:[%s376_s0] sm:$0xff] }
   0x7   :  { %v266_v26 = vpack.c.bf16 %v30_v25, %v29_v24  ;;  %v167_v28 = vld [vmem:[%s377_s2] ss:$0 sm:$0xff] }
   0xc   :  { %244 = vmatpush3.bf16.xpose.msk.msra.mxu0 %vm303_vm1, %v242_v8 }
   0xd   :  { %245 = vmatprep.subr.bf16.mxu0 %v272_v0 }
  0x14   :  { %248 = vmatpush3.bf16.xpose.msk.msra.mxu0 %vm303_vm1, %v246_v11 }
  0x15   :  { %249 = vmatprep.subr.bf16.mxu0 %v272_v0 }
  0x1c   :  { %252 = vmatpush3.bf16.xpose.msk.msra.mxu0 %vm303_vm1, %v250_v14 }
  0x1d   :  { %253 = vmatprep.subr.bf16.mxu0 %v272_v0 }
  0x24   :  { %256 = vmatpush3.bf16.xpose.msk.msra.mxu0 %vm303_vm1, %v254_v17 }
  0x25   :  { %257 = vmatprep.subr.bf16.mxu0 %v272_v0 }
  0x2c   :  { %260 = vmatpush3.bf16.xpose.msk.msra.mxu0 %vm303_vm1, %v258_v20 }
  0x2d   :  { %261 = vmatprep.subr.bf16.mxu0 %v272_v0 }
  0x34   :  { %264 = vmatpush3.bf16.xpose.msk.msra.mxu0 %vm303_vm1, %v262_v23 }
  0x35   :  { %265 = vmatprep.subr.bf16.mxu0 %v272_v0 }
  0x3c   :  { %268 = vmatpush3.bf16.xpose.msk.msra.mxu0 %vm303_vm1, %v266_v26 }
  0x43   :  { %235 = vmatmul.mubr.msk.f32.vlgmr.msra.gmra.mrb[0].mxu0 %vm38_vm0, %v14_v27 }
 0x116   :  { %v156_v29 = vpop.f32.mrb[0].mxu0 }
 0x117   :  { %v157_v30 = vadd.f32 %v167_v28, %v156_v29  ;;  %v236_v31 = vpop.f32.mrb[1].mxu0 }
 0x119   :  { %v160_v32 = vmax.f32 %v157_v30, 0.0 }
 0x11b   :  { %162 = vst.msk [vmem:[%s378_s3] sm:$0xff] %vm161_vm3, %v160_v32 }

</bundles_post_ra>
